<compile_context>
chip_gen: v7x
topology: tpu7x:2x2x1
jax: 0.10.0
libtpu: 0.0.40
codegen_flags: <defaults>
</compile_context>

<pallas_src>
import functools

import jax
import jax.numpy as jnp
import numpy as np
from jax.experimental import pallas as pl
from jax.experimental.pallas import tpu as pltpu


def vv_attention_kernel(x_ref, wqkv_ref, bqkv_ref, wproj_ref, bproj_ref,
                        out_vv_ref, out_ori_ref, *, num_heads, scale):
    N, C = x_ref.shape[1], x_ref.shape[2]
    hd = C // num_heads

    x = x_ref[0]                                       # (N, C) fp32
    x_bf = x.astype(jnp.bfloat16)

    # qkv projection: weight arrives pre-transposed (C, 3C), bf16.
    qkv = jnp.dot(x_bf, wqkv_ref[...],
                  preferred_element_type=jnp.float32) + bqkv_ref[...]   # (N, 3C) f32

    q = qkv[:, :C]
    k = qkv[:, C:2 * C]
    v = qkv[:, 2 * C:]

    # (N, C) -> (H, N, hd): static lane slices + leading-axis stack.
    def split_heads(t):
        return jnp.stack([t[:, h * hd:(h + 1) * hd] for h in range(num_heads)],
                         axis=0)

    qh = split_heads(q).astype(jnp.bfloat16)
    kh = split_heads(k).astype(jnp.bfloat16)
    vh = split_heads(v).astype(jnp.bfloat16)

    def softmax_rows(s):                               # fp32 softmax, last dim
        s = s - jnp.max(s, axis=-1, keepdims=True)
        p = jnp.exp(s)
        return p * pl.reciprocal(jnp.sum(p, axis=-1, keepdims=True), approx=True)

    # --- ordinary attention path: softmax(q k^T * scale) @ v ---
    s_ori = jnp.einsum('hnd,hmd->hnm', qh, kh,
                       preferred_element_type=jnp.float32) * scale       # (H,N,N)
    p_ori = softmax_rows(s_ori).astype(jnp.bfloat16)
    o_ori = jnp.einsum('hnm,hmd->hnd', p_ori, vh,
                       preferred_element_type=jnp.float32)               # (H,N,hd)

    # --- V-V attention path (q = k = v): softmax(v v^T * scale) @ v ---
    s_vv = jnp.einsum('hnd,hmd->hnm', vh, vh,
                      preferred_element_type=jnp.float32) * scale
    p_vv = softmax_rows(s_vv).astype(jnp.bfloat16)
    o_vv = jnp.einsum('hnm,hmd->hnd', p_vv, vh,
                      preferred_element_type=jnp.float32)

    # (H, N, hd) -> (N, C)
    def merge_heads(t):
        return jnp.concatenate([t[h] for h in range(num_heads)], axis=-1)

    wproj = wproj_ref[...]                             # (C, C) bf16, pre-transposed
    bproj = bproj_ref[...]                             # (1, C) fp32

    y_vv = jnp.dot(merge_heads(o_vv).astype(jnp.bfloat16), wproj,
                   preferred_element_type=jnp.float32) + bproj
    y_ori = jnp.dot(merge_heads(o_ori).astype(jnp.bfloat16), wproj,
                    preferred_element_type=jnp.float32) + bproj

    out_vv_ref[0] = y_vv.astype(out_vv_ref.dtype)
    out_ori_ref[0] = y_ori.astype(out_ori_ref.dtype)


def vv_attention(x, params, num_heads):
    """x: (B, N, C) fp32. Returns [x_vv, x_ori] matching the PyTorch forward."""
    B, N, C = x.shape
    hd = C // num_heads
    scale = float(hd) ** -0.5

    # Host-side layout/dtype plumbing (free): contraction-dim-last, bf16 weights.
    wqkv_t = params["wqkv"].T.astype(jnp.bfloat16)     # (C, 3C)
    wproj_t = params["wproj"].T.astype(jnp.bfloat16)   # (C, C)
    bqkv = params["bqkv"].astype(jnp.float32)          # (1, 3C)
    bproj = params["bproj"].astype(jnp.float32)        # (1, C)

    def full(arr):   # grid-invariant operand: whole array, constant block index
        return pl.BlockSpec(arr.shape, lambda b, _n=len(arr.shape): (0,) * _n)

    kernel = functools.partial(vv_attention_kernel,
                               num_heads=num_heads, scale=scale)
    out_vv, out_ori = pl.pallas_call(
        kernel,
        out_shape=(jax.ShapeDtypeStruct((B, N, C), x.dtype),
                   jax.ShapeDtypeStruct((B, N, C), x.dtype)),
        grid_spec=pltpu.PrefetchScalarGridSpec(
            num_scalar_prefetch=0,
            grid=(B,),
            in_specs=[
                pl.BlockSpec((1, N, C), lambda b: (b, 0, 0)),   # x
                full(wqkv_t),                                   # qkv weight (C,3C)
                full(bqkv),                                     # qkv bias   (1,3C)
                full(wproj_t),                                  # proj weight (C,C)
                full(bproj),                                    # proj bias  (1,C)
            ],
            out_specs=[pl.BlockSpec((1, N, C), lambda b: (b, 0, 0)),
                       pl.BlockSpec((1, N, C), lambda b: (b, 0, 0))],
        ),
        compiler_params=pltpu.CompilerParams(
            dimension_semantics=("parallel",),
            vmem_limit_bytes=64 * 1024 * 1024),
    )(x, wqkv_t, bqkv, wproj_t, bproj)
    return [out_vv, out_ori]


def reference(x, p, num_heads):
    """Pure-JAX fp32 reference mirroring the PyTorch VVAttention.forward."""
    B, N, C = x.shape
    hd = C // num_heads
    scale = hd ** -0.5
    qkv = x @ p["wqkv"].T + p["bqkv"][0]                         # (B, N, 3C)
    qkv = qkv.reshape(B, N, 3, num_heads, hd).transpose(2, 0, 3, 1, 4)
    q, k, v = qkv[0], qkv[1], qkv[2]                             # (B, H, N, hd)
    attn_ori = jax.nn.softmax(q @ jnp.swapaxes(k, -2, -1) * scale, axis=-1)
    attn_vv = jax.nn.softmax(v @ jnp.swapaxes(v, -2, -1) * scale, axis=-1)
    x_ori = (attn_ori @ v).transpose(0, 2, 1, 3).reshape(B, N, C)
    x_vv = (attn_vv @ v).transpose(0, 2, 1, 3).reshape(B, N, C)
    proj = lambda t: t @ p["wproj"].T + p["bproj"][0]
    return [proj(x_vv), proj(x_ori)]


def make_params(key, dim):
    C = dim
    ks = jax.random.split(key, 4)
    s = 0.25
    return {
        # qkv linear (kernel also covers qkv_bias=True; pass zeros for bias=False)
        "wqkv":  s * jax.random.normal(ks[0], (3 * C, C), jnp.float32),
        "bqkv":  s * jax.random.normal(ks[1], (1, 3 * C), jnp.float32),
        # proj linear (out_dim == dim, as used in AnomalyCLIP)
        "wproj": s * jax.random.normal(ks[2], (C, C), jnp.float32),
        "bproj": s * jax.random.normal(ks[3], (1, C), jnp.float32),
    }


if __name__ == "__main__":
    B, N, C, H = 2, 8, 32, 4          # batch, tokens, dim, heads (hd = 8)
    key = jax.random.PRNGKey(0)
    kx, kp = jax.random.split(key)
    x = jax.random.normal(kx, (B, N, C), jnp.float32)
    params = make_params(kp, C)

    out_vv, out_ori = vv_attention(x, params, num_heads=H)
    out_vv = jax.block_until_ready(out_vv)
    out_ori = jax.block_until_ready(out_ori)

    ref_vv, ref_ori = reference(x, params, H)
    # bf16 matmul inputs (fp32 accumulation) + approx reciprocal -> looser
    # tolerance than a pure-fp32 kernel would need.
    np.testing.assert_allclose(np.asarray(out_vv), np.asarray(ref_vv),
                               rtol=2e-2, atol=1e-1)
    np.testing.assert_allclose(np.asarray(out_ori), np.asarray(ref_ori),
                               rtol=2e-2, atol=1e-1)
    print("KERNEL_OK")
</pallas_src>

<mosaic_0001>
module attributes {stable_mosaic.version = 11 : i64} {
  func.func @vv_attention_kernel(%arg0: i32, %arg1: memref<1x8x32xf32, #tpu.memory_space<vmem>>, %arg2: memref<32x96xbf16, #tpu.memory_space<vmem>>, %arg3: memref<1x96xf32, #tpu.memory_space<vmem>>, %arg4: memref<32x32xbf16, #tpu.memory_space<vmem>>, %arg5: memref<1x32xf32, #tpu.memory_space<vmem>>, %arg6: memref<1x8x32xf32, #tpu.memory_space<vmem>>, %arg7: memref<1x8x32xf32, #tpu.memory_space<vmem>>) attributes {dimension_semantics = [#tpu.dimension_semantics<parallel>], iteration_bounds = array<i64: 2>, scalar_prefetch = 0 : i64, scratch_operands = 0 : i64, tpu.core_type = #tpu.core_type<tc>, window_params = [{transform_indices = @transform_0, window_bounds = array<i64: 1, 8, 32>}, {pipeline_mode = #tpu.pipeline_mode<synchronous>, transform_indices = @transform_1, window_bounds = array<i64: 32, 96>}, {pipeline_mode = #tpu.pipeline_mode<synchronous>, transform_indices = @transform_2, window_bounds = array<i64: 1, 96>}, {pipeline_mode = #tpu.pipeline_mode<synchronous>, transform_indices = @transform_3, window_bounds = array<i64: 32, 32>}, {pipeline_mode = #tpu.pipeline_mode<synchronous>, transform_indices = @transform_4, window_bounds = array<i64: 1, 32>}, {transform_indices = @transform_5, window_bounds = array<i64: 1, 8, 32>}, {transform_indices = @transform_6, window_bounds = array<i64: 1, 8, 32>}]} {
    %c0 = arith.constant 0 : index
    %c0_0 = arith.constant 0 : index
    %c0_1 = arith.constant 0 : index
    %0 = vector.load %arg1[%c0, %c0_0, %c0_1] : memref<1x8x32xf32, #tpu.memory_space<vmem>>, vector<1x8x32xf32>
    %1 = vector.shape_cast %0 : vector<1x8x32xf32> to vector<8x32xf32>
    %2 = arith.truncf %1 : vector<8x32xf32> to vector<8x32xbf16>
    %c0_2 = arith.constant 0 : index
    %c0_3 = arith.constant 0 : index
    %3 = vector.load %arg2[%c0_2, %c0_3] : memref<32x96xbf16, #tpu.memory_space<vmem>>, vector<32x96xbf16>
    %cst = arith.constant dense<0.000000e+00> : vector<8x96xf32>
    %4 = tpu.matmul %2, %3, %cst {dimension_numbers = #tpu.dot_dimension_numbers<[1], [0], [0], [1], [0, 0, 1, 1], [], []>} : vector<8x32xbf16>, vector<32x96xbf16>, vector<8x96xf32> -> vector<8x96xf32>
    %c0_4 = arith.constant 0 : index
    %c0_5 = arith.constant 0 : index
    %5 = vector.load %arg3[%c0_4, %c0_5] : memref<1x96xf32, #tpu.memory_space<vmem>>, vector<1x96xf32>
    %6 = vector.broadcast %5 : vector<1x96xf32> to vector<8x96xf32>
    %7 = arith.addf %4, %6 : vector<8x96xf32>
    %8 = vector.extract_strided_slice %7 {offsets = [0, 0], sizes = [8, 32], strides = [1, 1]} : vector<8x96xf32> to vector<8x32xf32>
    %9 = vector.extract_strided_slice %7 {offsets = [0, 32], sizes = [8, 32], strides = [1, 1]} : vector<8x96xf32> to vector<8x32xf32>
    %10 = vector.extract_strided_slice %7 {offsets = [0, 64], sizes = [8, 32], strides = [1, 1]} : vector<8x96xf32> to vector<8x32xf32>
    %11 = vector.extract_strided_slice %8 {offsets = [0, 0], sizes = [8, 8], strides = [1, 1]} : vector<8x32xf32> to vector<8x8xf32>
    %12 = vector.extract_strided_slice %8 {offsets = [0, 8], sizes = [8, 8], strides = [1, 1]} : vector<8x32xf32> to vector<8x8xf32>
    %13 = vector.extract_strided_slice %8 {offsets = [0, 16], sizes = [8, 8], strides = [1, 1]} : vector<8x32xf32> to vector<8x8xf32>
    %14 = vector.extract_strided_slice %8 {offsets = [0, 24], sizes = [8, 8], strides = [1, 1]} : vector<8x32xf32> to vector<8x8xf32>
    %15 = vector.shape_cast %11 : vector<8x8xf32> to vector<1x8x8xf32>
    %16 = vector.shape_cast %12 : vector<8x8xf32> to vector<1x8x8xf32>
    %17 = vector.shape_cast %13 : vector<8x8xf32> to vector<1x8x8xf32>
    %18 = vector.shape_cast %14 : vector<8x8xf32> to vector<1x8x8xf32>
    %19 = tpu.concatenate %15, %16, %17, %18 in 0 : vector<1x8x8xf32>, vector<1x8x8xf32>, vector<1x8x8xf32>, vector<1x8x8xf32> -> vector<4x8x8xf32>
    %20 = arith.truncf %19 : vector<4x8x8xf32> to vector<4x8x8xbf16>
    %21 = vector.extract_strided_slice %9 {offsets = [0, 0], sizes = [8, 8], strides = [1, 1]} : vector<8x32xf32> to vector<8x8xf32>
    %22 = vector.extract_strided_slice %9 {offsets = [0, 8], sizes = [8, 8], strides = [1, 1]} : vector<8x32xf32> to vector<8x8xf32>
    %23 = vector.extract_strided_slice %9 {offsets = [0, 16], sizes = [8, 8], strides = [1, 1]} : vector<8x32xf32> to vector<8x8xf32>
    %24 = vector.extract_strided_slice %9 {offsets = [0, 24], sizes = [8, 8], strides = [1, 1]} : vector<8x32xf32> to vector<8x8xf32>
    %25 = vector.shape_cast %21 : vector<8x8xf32> to vector<1x8x8xf32>
    %26 = vector.shape_cast %22 : vector<8x8xf32> to vector<1x8x8xf32>
    %27 = vector.shape_cast %23 : vector<8x8xf32> to vector<1x8x8xf32>
    %28 = vector.shape_cast %24 : vector<8x8xf32> to vector<1x8x8xf32>
    %29 = tpu.concatenate %25, %26, %27, %28 in 0 : vector<1x8x8xf32>, vector<1x8x8xf32>, vector<1x8x8xf32>, vector<1x8x8xf32> -> vector<4x8x8xf32>
    %30 = arith.truncf %29 : vector<4x8x8xf32> to vector<4x8x8xbf16>
    %31 = vector.extract_strided_slice %10 {offsets = [0, 0], sizes = [8, 8], strides = [1, 1]} : vector<8x32xf32> to vector<8x8xf32>
    %32 = vector.extract_strided_slice %10 {offsets = [0, 8], sizes = [8, 8], strides = [1, 1]} : vector<8x32xf32> to vector<8x8xf32>
    %33 = vector.extract_strided_slice %10 {offsets = [0, 16], sizes = [8, 8], strides = [1, 1]} : vector<8x32xf32> to vector<8x8xf32>
    %34 = vector.extract_strided_slice %10 {offsets = [0, 24], sizes = [8, 8], strides = [1, 1]} : vector<8x32xf32> to vector<8x8xf32>
    %35 = vector.shape_cast %31 : vector<8x8xf32> to vector<1x8x8xf32>
    %36 = vector.shape_cast %32 : vector<8x8xf32> to vector<1x8x8xf32>
    %37 = vector.shape_cast %33 : vector<8x8xf32> to vector<1x8x8xf32>
    %38 = vector.shape_cast %34 : vector<8x8xf32> to vector<1x8x8xf32>
    %39 = tpu.concatenate %35, %36, %37, %38 in 0 : vector<1x8x8xf32>, vector<1x8x8xf32>, vector<1x8x8xf32>, vector<1x8x8xf32> -> vector<4x8x8xf32>
    %40 = arith.truncf %39 : vector<4x8x8xf32> to vector<4x8x8xbf16>
    "tpu.trace_start"() <{level = 10 : i32, message = "hnd,hmd->hnm"}> : () -> ()
    %cst_6 = arith.constant dense<0.000000e+00> : vector<4x8x8xf32>
    %41 = tpu.matmul %20, %30, %cst_6 {dimension_numbers = #tpu.dot_dimension_numbers<[2], [2], [1], [1], [0, 0, 0, 1, 1, 1], [0], [0]>} : vector<4x8x8xbf16>, vector<4x8x8xbf16>, vector<4x8x8xf32> -> vector<4x8x8xf32>
    "tpu.trace_stop"() : () -> ()
    %cst_7 = arith.constant 0.353553385 : f32
    %42 = vector.broadcast %cst_7 : f32 to vector<4x8x8xf32>
    %43 = arith.mulf %41, %42 : vector<4x8x8xf32>
    %cst_8 = arith.constant dense<0xFF800000> : vector<4x8xf32>
    %44 = vector.multi_reduction <maximumf>, %43, %cst_8 [2] : vector<4x8x8xf32> to vector<4x8xf32>
    %45 = vector.shape_cast %44 : vector<4x8xf32> to vector<4x8x1xf32>
    %46 = vector.broadcast %45 : vector<4x8x1xf32> to vector<4x8x8xf32>
    %47 = arith.subf %43, %46 : vector<4x8x8xf32>
    %48 = math.exp %47 : vector<4x8x8xf32>
    %cst_9 = arith.constant dense<0.000000e+00> : vector<4x8xf32>
    %49 = vector.multi_reduction <add>, %48, %cst_9 [2] : vector<4x8x8xf32> to vector<4x8xf32>
    %50 = vector.shape_cast %49 : vector<4x8xf32> to vector<4x8x1xf32>
    %51 = tpu.reciprocal %50 {approx = true} : vector<4x8x1xf32> -> vector<4x8x1xf32>
    %52 = vector.broadcast %51 : vector<4x8x1xf32> to vector<4x8x8xf32>
    %53 = arith.mulf %48, %52 : vector<4x8x8xf32>
    %54 = arith.truncf %53 : vector<4x8x8xf32> to vector<4x8x8xbf16>
    "tpu.trace_start"() <{level = 10 : i32, message = "hnm,hmd->hnd"}> : () -> ()
    %cst_10 = arith.constant dense<0.000000e+00> : vector<4x8x8xf32>
    %55 = tpu.matmul %54, %40, %cst_10 {dimension_numbers = #tpu.dot_dimension_numbers<[2], [1], [1], [2], [0, 0, 0, 1, 1, 2], [0], [0]>} : vector<4x8x8xbf16>, vector<4x8x8xbf16>, vector<4x8x8xf32> -> vector<4x8x8xf32>
    "tpu.trace_stop"() : () -> ()
    "tpu.trace_start"() <{level = 10 : i32, message = "hnd,hmd->hnm"}> : () -> ()
    %cst_11 = arith.constant dense<0.000000e+00> : vector<4x8x8xf32>
    %56 = tpu.matmul %40, %40, %cst_11 {dimension_numbers = #tpu.dot_dimension_numbers<[2], [2], [1], [1], [0, 0, 0, 1, 1, 1], [0], [0]>} : vector<4x8x8xbf16>, vector<4x8x8xbf16>, vector<4x8x8xf32> -> vector<4x8x8xf32>
    "tpu.trace_stop"() : () -> ()
    %cst_12 = arith.constant 0.353553385 : f32
    %57 = vector.broadcast %cst_12 : f32 to vector<4x8x8xf32>
    %58 = arith.mulf %56, %57 : vector<4x8x8xf32>
    %cst_13 = arith.constant dense<0xFF800000> : vector<4x8xf32>
    %59 = vector.multi_reduction <maximumf>, %58, %cst_13 [2] : vector<4x8x8xf32> to vector<4x8xf32>
    %60 = vector.shape_cast %59 : vector<4x8xf32> to vector<4x8x1xf32>
    %61 = vector.broadcast %60 : vector<4x8x1xf32> to vector<4x8x8xf32>
    %62 = arith.subf %58, %61 : vector<4x8x8xf32>
    %63 = math.exp %62 : vector<4x8x8xf32>
    %cst_14 = arith.constant dense<0.000000e+00> : vector<4x8xf32>
    %64 = vector.multi_reduction <add>, %63, %cst_14 [2] : vector<4x8x8xf32> to vector<4x8xf32>
    %65 = vector.shape_cast %64 : vector<4x8xf32> to vector<4x8x1xf32>
    %66 = tpu.reciprocal %65 {approx = true} : vector<4x8x1xf32> -> vector<4x8x1xf32>
    %67 = vector.broadcast %66 : vector<4x8x1xf32> to vector<4x8x8xf32>
    %68 = arith.mulf %63, %67 : vector<4x8x8xf32>
    %69 = arith.truncf %68 : vector<4x8x8xf32> to vector<4x8x8xbf16>
    "tpu.trace_start"() <{level = 10 : i32, message = "hnm,hmd->hnd"}> : () -> ()
    %cst_15 = arith.constant dense<0.000000e+00> : vector<4x8x8xf32>
    %70 = tpu.matmul %69, %40, %cst_15 {dimension_numbers = #tpu.dot_dimension_numbers<[2], [1], [1], [2], [0, 0, 0, 1, 1, 2], [0], [0]>} : vector<4x8x8xbf16>, vector<4x8x8xbf16>, vector<4x8x8xf32> -> vector<4x8x8xf32>
    "tpu.trace_stop"() : () -> ()
    %c0_16 = arith.constant 0 : index
    %c0_17 = arith.constant 0 : index
    %71 = vector.load %arg4[%c0_16, %c0_17] : memref<32x32xbf16, #tpu.memory_space<vmem>>, vector<32x32xbf16>
    %c0_18 = arith.constant 0 : index
    %c0_19 = arith.constant 0 : index
    %72 = vector.load %arg5[%c0_18, %c0_19] : memref<1x32xf32, #tpu.memory_space<vmem>>, vector<1x32xf32>
    %73 = vector.extract_strided_slice %70 {offsets = [0, 0, 0], sizes = [1, 8, 8], strides = [1, 1, 1]} : vector<4x8x8xf32> to vector<1x8x8xf32>
    %74 = vector.shape_cast %73 : vector<1x8x8xf32> to vector<8x8xf32>
    %75 = vector.extract_strided_slice %70 {offsets = [1, 0, 0], sizes = [1, 8, 8], strides = [1, 1, 1]} : vector<4x8x8xf32> to vector<1x8x8xf32>
    %76 = vector.shape_cast %75 : vector<1x8x8xf32> to vector<8x8xf32>
    %77 = vector.extract_strided_slice %70 {offsets = [2, 0, 0], sizes = [1, 8, 8], strides = [1, 1, 1]} : vector<4x8x8xf32> to vector<1x8x8xf32>
    %78 = vector.shape_cast %77 : vector<1x8x8xf32> to vector<8x8xf32>
    %79 = vector.extract_strided_slice %70 {offsets = [3, 0, 0], sizes = [1, 8, 8], strides = [1, 1, 1]} : vector<4x8x8xf32> to vector<1x8x8xf32>
    %80 = vector.shape_cast %79 : vector<1x8x8xf32> to vector<8x8xf32>
    %81 = tpu.concatenate %74, %76, %78, %80 in 1 : vector<8x8xf32>, vector<8x8xf32>, vector<8x8xf32>, vector<8x8xf32> -> vector<8x32xf32>
    %82 = arith.truncf %81 : vector<8x32xf32> to vector<8x32xbf16>
    %cst_20 = arith.constant dense<0.000000e+00> : vector<8x32xf32>
    %83 = tpu.matmul %82, %71, %cst_20 {dimension_numbers = #tpu.dot_dimension_numbers<[1], [0], [0], [1], [0, 0, 1, 1], [], []>} : vector<8x32xbf16>, vector<32x32xbf16>, vector<8x32xf32> -> vector<8x32xf32>
    %84 = vector.broadcast %72 : vector<1x32xf32> to vector<8x32xf32>
    %85 = arith.addf %83, %84 : vector<8x32xf32>
    %86 = vector.extract_strided_slice %55 {offsets = [0, 0, 0], sizes = [1, 8, 8], strides = [1, 1, 1]} : vector<4x8x8xf32> to vector<1x8x8xf32>
    %87 = vector.shape_cast %86 : vector<1x8x8xf32> to vector<8x8xf32>
    %88 = vector.extract_strided_slice %55 {offsets = [1, 0, 0], sizes = [1, 8, 8], strides = [1, 1, 1]} : vector<4x8x8xf32> to vector<1x8x8xf32>
    %89 = vector.shape_cast %88 : vector<1x8x8xf32> to vector<8x8xf32>
    %90 = vector.extract_strided_slice %55 {offsets = [2, 0, 0], sizes = [1, 8, 8], strides = [1, 1, 1]} : vector<4x8x8xf32> to vector<1x8x8xf32>
    %91 = vector.shape_cast %90 : vector<1x8x8xf32> to vector<8x8xf32>
    %92 = vector.extract_strided_slice %55 {offsets = [3, 0, 0], sizes = [1, 8, 8], strides = [1, 1, 1]} : vector<4x8x8xf32> to vector<1x8x8xf32>
    %93 = vector.shape_cast %92 : vector<1x8x8xf32> to vector<8x8xf32>
    %94 = tpu.concatenate %87, %89, %91, %93 in 1 : vector<8x8xf32>, vector<8x8xf32>, vector<8x8xf32>, vector<8x8xf32> -> vector<8x32xf32>
    %95 = arith.truncf %94 : vector<8x32xf32> to vector<8x32xbf16>
    %cst_21 = arith.constant dense<0.000000e+00> : vector<8x32xf32>
    %96 = tpu.matmul %95, %71, %cst_21 {dimension_numbers = #tpu.dot_dimension_numbers<[1], [0], [0], [1], [0, 0, 1, 1], [], []>} : vector<8x32xbf16>, vector<32x32xbf16>, vector<8x32xf32> -> vector<8x32xf32>
    %97 = vector.broadcast %72 : vector<1x32xf32> to vector<8x32xf32>
    %98 = arith.addf %96, %97 : vector<8x32xf32>
    %c0_22 = arith.constant 0 : index
    %c0_23 = arith.constant 0 : index
    %c0_24 = arith.constant 0 : index
    %99 = vector.load %arg6[%c0_22, %c0_23, %c0_24] : memref<1x8x32xf32, #tpu.memory_space<vmem>>, vector<1x8x32xf32>
    %100 = vector.shape_cast %99 : vector<1x8x32xf32> to vector<8x32xf32>
    %101 = vector.shape_cast %85 : vector<8x32xf32> to vector<1x8x32xf32>
    tpu.vector_store %arg6[%c0_22, %c0_23, %c0_24], %101 {strides = array<i32>} : memref<1x8x32xf32, #tpu.memory_space<vmem>>, vector<1x8x32xf32>,
    %c0_25 = arith.constant 0 : index
    %c0_26 = arith.constant 0 : index
    %c0_27 = arith.constant 0 : index
    %102 = vector.load %arg7[%c0_25, %c0_26, %c0_27] : memref<1x8x32xf32, #tpu.memory_space<vmem>>, vector<1x8x32xf32>
    %103 = vector.shape_cast %102 : vector<1x8x32xf32> to vector<8x32xf32>
    %104 = vector.shape_cast %98 : vector<8x32xf32> to vector<1x8x32xf32>
    tpu.vector_store %arg7[%c0_25, %c0_26, %c0_27], %104 {strides = array<i32>} : memref<1x8x32xf32, #tpu.memory_space<vmem>>, vector<1x8x32xf32>,
    return
  }
  func.func @transform_0(%arg0: i32) -> (i32, i32, i32) {
    %c0_i32 = arith.constant 0 : i32
    %c0_i32_0 = arith.constant 0 : i32
    %c0_i32_1 = arith.constant 0 : i32
    return %arg0, %c0_i32, %c0_i32_0 : i32, i32, i32
  }
  func.func @transform_1(%arg0: i32) -> (i32, i32) {
    %c0_i32 = arith.constant 0 : i32
    %c0_i32_0 = arith.constant 0 : i32
    %c0_i32_1 = arith.constant 0 : i32
    return %c0_i32, %c0_i32_0 : i32, i32
  }
  func.func @transform_2(%arg0: i32) -> (i32, i32) {
    %c0_i32 = arith.constant 0 : i32
    %c0_i32_0 = arith.constant 0 : i32
    %c0_i32_1 = arith.constant 0 : i32
    return %c0_i32, %c0_i32_0 : i32, i32
  }
  func.func @transform_3(%arg0: i32) -> (i32, i32) {
    %c0_i32 = arith.constant 0 : i32
    %c0_i32_0 = arith.constant 0 : i32
    %c0_i32_1 = arith.constant 0 : i32
    return %c0_i32, %c0_i32_0 : i32, i32
  }
  func.func @transform_4(%arg0: i32) -> (i32, i32) {
    %c0_i32 = arith.constant 0 : i32
    %c0_i32_0 = arith.constant 0 : i32
    %c0_i32_1 = arith.constant 0 : i32
    return %c0_i32, %c0_i32_0 : i32, i32
  }
  func.func @transform_5(%arg0: i32) -> (i32, i32, i32) {
    %c0_i32 = arith.constant 0 : i32
    %c0_i32_0 = arith.constant 0 : i32
    %c0_i32_1 = arith.constant 0 : i32
    return %arg0, %c0_i32, %c0_i32_0 : i32, i32, i32
  }
  func.func @transform_6(%arg0: i32) -> (i32, i32, i32) {
    %c0_i32 = arith.constant 0 : i32
    %c0_i32_0 = arith.constant 0 : i32
    %c0_i32_1 = arith.constant 0 : i32
    return %arg0, %c0_i32, %c0_i32_0 : i32, i32, i32
  }
}

</mosaic_0001>

<bundles_post_ra>
// kernel: tpu_custom_call.1
= control target key start
LH: loop header
LB: loop body
LE: loop exit
PB: predicated region body
PF: predicated region fallthrough
CT: control target
= control target key end

     0   :  { %12 = vsyncpa [#allocation3], 0  ;;  %s2718_s0 = inlined_call_operand.hbm [shape: f32[2,8,32], index: 0, kind: input, shape index: {}]   ;;  %s2719_s1 = inlined_call_operand.hbm [shape: bf16[32,96], index: 1, kind: input, shape index: {}]   ;;  %s2720_s2 = inlined_call_operand.hbm [shape: f32[1,96], index: 2, kind: input, shape index: {}]   ;;  %s2721_s3 = inlined_call_operand.hbm [shape: bf16[32,32], index: 3, kind: input, shape index: {}]   ;;  %s2722_s4 = inlined_call_operand.hbm [shape: f32[1,32], index: 4, kind: input, shape index: {}]   ;;  %s2723_s5 = inlined_call_operand.hbm [shape: f32[2,8,32], index: 5, kind: output, shape index: {0}]   ;;  %s2724_s6 = inlined_call_operand.hbm [shape: f32[2,8,32], index: 6, kind: output, shape index: {1}]  }
   0x1   :  { %14 = vsyncpa [#allocation3 + $0x1], 0 }
   0x2   :  { %15 = vsyncpa [#allocation6], 0 }
   0x3   :  { %16 = vsyncpa [#allocation9], 0 }
   0x4   :  { %17 = vsyncpa [#allocation4], 0 }
   0x5   :  { %19 = vsyncpa [#allocation4 + $0x1], 0 }
   0x6   :  { %20 = vsyncpa [#allocation13], 0 }
   0x7   :  { %22 = vsyncpa [#allocation13 + $0x1], 0  ;;  %s2235_s21 = smov 0   ;;  %s2237_s22 = smov 0  }
   0x8   :  { %s2239_s23 = smov 0   ;;  %s2241_s24 = smov 0  }
   0x9 LB: > { %s2181_s25 = smov [#allocation5]   ;;  %s2256_s27 = sadd.s32 4294967295, %s2179_s24   ;;  %s2179_s24 = sphi %s2241_s24, %s2748_s24   ;;  %s2175_s23 = sphi %s2239_s23, %s2747_s23   ;;  %s2171_s22 = sphi %s2237_s22, %s2746_s22   ;;  %s2167_s21 = sphi %s2235_s21, %s2745_s21  }
   0xa   : > { %s207_s26 = sshll.u32 %s2181_s25, 4  ;;  %p1568_p0 = scmp.ge.s32.totalorder %s2179_s24, 1  ;;  %s2261_s26 = int_to_ptr.vmem [resolvable:$true] %s207_s26 }
   0xb   : > { %p2725_p1 = scmp.eq.s32.totalorder %s2256_s27, 0  ;;  %p195_p2 = scmp.lt.s32.totalorder %s2179_s24, 3 }
   0xc   : > { %s2182_s29 = smov [#allocation8]   ;;  %s2183_s8 = smov [#allocation7]  }
   0xd   : > { %p2263_p3 = pnand %p1568_p0, %p195_p2  ;;  %s231_s30 = sshll.u32 %s2182_s29, 4  ;;  %s2276_s30 = int_to_ptr.vmem [resolvable:$true] %s231_s30 }
   0xe   : > { %s221_s9 = sshll.u32 %s2183_s8, 4  ;;  %s1931_s12 = scalar_lea.hbm %s2719_s1, 256  ;;  %s2278_s9 = int_to_ptr.vmem [resolvable:$true] %s221_s9 }
   0xf   : > { %s2728_s28 = scalar_select %p2263_p3, 1, 0 }
  0x10   : > { %p1798_p5 = pneg %p2263_p3  ;;  %p1932_p7 = scmp.ne.s32.totalorder %s2719_s1, %s1931_s12 }
  0x11   : > { %p1938_p11 = scmp.lt.u32.totalorder %s1931_s12, %s2719_s1 }
  0x12   : > { %p2272_p6 = pnand %p1798_p5, %p2725_p1 }
  0x14   : > { %p2288_p8 = pneg %p2272_p6 }
  0x16   : > { %p1934_p9 = pnand %p2288_p8, %p1932_p7 }
  0x18   : > { %p1935_p10 = pneg %p1934_p9 }
  0x1a   : > { %p1940_p12 = pnand %p1938_p11, %p1935_p10 }
  0x1c   : > { %1943 = shalt.err (!%p1940_p12)
}
  0x1d   : > { %s1944_s18 = scalar_lea.vmem %s2261_s26, 256  ;;  %p1952_p5 = scmp.lt.s32.totalorder %s2261_s26, %s2261_s26 }
  0x1e   : > { %p1945_p13 = scmp.ne.s32.totalorder %s2261_s26, %s1944_s18  ;;  %p1953_p4 = scmp.lt.s32.totalorder %s1944_s18, %s1944_s18 }
  0x20   : > { %p1947_p0 = pnand %p1945_p13, %p2288_p8  ;;  %p1954_p7 = por %p1953_p4, %p1952_p5 }
  0x22   : > { %p1948_p2 = pneg %p1947_p0 }
  0x24   : > { %p1955_p9 = pnand %p1954_p7, %p1948_p2 }
  0x26   : > { %1958 = shalt.err (!%p1955_p9)
}
  0x27   : > { %s2184_s19 = smov 64   ;;  %s2185_s20 = smov 4  }
  0x28   : > { %1801 = dma.hbm_to_vmem [thread:$0]  (!%p2272_p6), %s2719_s1, 256, %s2261_s26, [#allocation6], %s2184_s19, %s2184_s19, %s2185_s20  }
  0x29   : > { %s1959_s11 = scalar_lea.hbm %s2721_s3, 256 }
  0x2a   : > { %p1960_p4 = scmp.ne.s32.totalorder %s2721_s3, %s1959_s11  ;;  %p1966_p12 = scmp.lt.u32.totalorder %s1959_s11, %s2721_s3 }
  0x2c   : > { %p1962_p10 = pnand %p1960_p4, %p2288_p8 }
  0x2e   : > { %p1963_p11 = pneg %p1962_p10 }
  0x30   : > { %p1968_p13 = pnand %p1966_p12, %p1963_p11 }
  0x32   : > { %1971 = shalt.err (!%p1968_p13)
}
  0x33   : > { %s1972_s26 = scalar_lea.vmem %s2276_s30, 256  ;;  %p1980_p7 = scmp.lt.s32.totalorder %s2276_s30, %s2276_s30 }
  0x34   : > { %p1973_p0 = scmp.ne.s32.totalorder %s2276_s30, %s1972_s26  ;;  %p1981_p9 = scmp.lt.s32.totalorder %s1972_s26, %s1972_s26 }
  0x36   : > { %p1975_p2 = pnand %p1973_p0, %p2288_p8  ;;  %p1982_p4 = por %p1981_p9, %p1980_p7 }
  0x38   : > { %p1976_p5 = pneg %p1975_p2 }
  0x3a   : > { %p1983_p10 = pnand %p1982_p4, %p1976_p5 }
  0x3c   : > { %1986 = shalt.err (!%p1983_p10)
}
  0x3d   : > { %1807 = dma.hbm_to_vmem [thread:$0]  (!%p2272_p6), %s2721_s3, 256, %s2276_s30, [#allocation9], %s2184_s19, %s2184_s19, %s2185_s20  }
  0x3e   : > { %s1987_s8 = scalar_lea.hbm %s2720_s2, 16 }
  0x3f   : > { %p1988_p11 = scmp.ne.s32.totalorder %s2720_s2, %s1987_s8  ;;  %p1994_p0 = scmp.lt.u32.totalorder %s1987_s8, %s2720_s2 }
  0x41   : > { %p1990_p12 = pnand %p1988_p11, %p2288_p8 }
  0x43   : > { %p1991_p13 = pneg %p1990_p12 }
  0x45   : > { %p1996_p2 = pnand %p1994_p0, %p1991_p13 }
  0x47   : > { %1999 = shalt.err (!%p1996_p2)
}
  0x48   : > { %s2000_s30 = scalar_lea.vmem %s2278_s9, 16  ;;  %s2007_s19 = scalar_lea.vmem %s2278_s9, 32 }
  0x49   : > { %p2001_p5 = scmp.ne.s32.totalorder %s2278_s9, %s2000_s30  ;;  %p2008_p4 = scmp.lt.s32.totalorder %s2278_s9, %s2278_s9 }
  0x4a   : > { %p2009_p10 = scmp.lt.s32.totalorder %s2007_s19, %s2000_s30 }
  0x4b   : > { %p2003_p7 = pnand %p2001_p5, %p2288_p8 }
  0x4c   : > { %p2010_p11 = por %p2009_p10, %p2008_p4 }
  0x4d   : > { %p2004_p9 = pneg %p2003_p7 }
  0x4f   : > { %p2011_p12 = pnand %p2010_p11, %p2004_p9 }
  0x51   : > { %2014 = shalt.err (!%p2011_p12)
}
  0x52   : > { %1804 = dma.hbm_to_vmem [thread:$0]  (!%p2272_p6), %s2720_s2, 16, %s2278_s9, [#allocation6]  }
  0x53   : > { %s2186_s16 = smov [#allocation10]   ;;  %s2015_s25 = scalar_lea.hbm %s2722_s4, 16 }
  0x54   : > { %s245_s26 = sshll.u32 %s2186_s16, 4  ;;  %p2016_p13 = scmp.ne.s32.totalorder %s2722_s4, %s2015_s25  ;;  %s246_s26 = int_to_ptr.vmem [resolvable:$true] %s245_s26 }
  0x55   : > { %p2022_p5 = scmp.lt.u32.totalorder %s2015_s25, %s2722_s4 }
  0x56   : > { %p2018_p0 = pnand %p2016_p13, %p2288_p8 }
  0x58   : > { %p2019_p2 = pneg %p2018_p0 }
  0x5a   : > { %p2024_p7 = pnand %p2022_p5, %p2019_p2 }
  0x5c   : > { %2027 = shalt.err (!%p2024_p7)
}
  0x5d   : > { %s2028_s9 = scalar_lea.vmem %s246_s26, 16  ;;  %s2035_s12 = scalar_lea.vmem %s246_s26, 32 }
  0x5e   : > { %p2029_p9 = scmp.ne.s32.totalorder %s246_s26, %s2028_s9  ;;  %p2036_p11 = scmp.lt.s32.totalorder %s246_s26, %s246_s26 }
  0x5f   : > { %p2037_p12 = scmp.lt.s32.totalorder %s2035_s12, %s2028_s9 }
  0x60   : > { %p2031_p4 = pnand %p2029_p9, %p2288_p8 }
  0x61   : > { %p2038_p1 = por %p2037_p12, %p2036_p11 }
  0x62   : > { %p2032_p10 = pneg %p2031_p4 }
  0x64   : > { %p2039_p3 = pnand %p2038_p1, %p2032_p10 }
  0x66   : > { %2042 = shalt.err (!%p2039_p3)
}
  0x67   : > { %1810 = dma.hbm_to_vmem [thread:$0]  (!%p2272_p6), %s2722_s4, 16, %s246_s26, [#allocation9]  }
  0x68   : > { %s1567_s15 = sadd.s32 4294967294, %s2179_s24   ;;  %s2376_s7 = sadd.s32 1, %s2179_s24  }
  0x69   : > { %s32_s19 = ssub.s32 %s2179_s24, %s2376_s7  ;;  %s35_s20 = sadd.s32 1, %s2175_s23 }
  0x6a   : > { %p33_p1 = scmp.eq.s32.totalorder %s32_s19, 0  ;;  %p42_p3 = scmp.ne.s32.totalorder %s2175_s23, %s2171_s22 }
  0x6b   : > { %p43_p8 = scmp.eq.s32.totalorder %s2179_s24, 0  ;;  %p48_p13 = scmp.ne.s32.totalorder %s2171_s22, %s2167_s21 }
  0x6c   : > { %s2387_s14 = scalar_select %p33_p1, %s2175_s23, %s35_s20  }
  0x6d   : > { %p2389_p0 = por %p43_p8, %p42_p3  ;;  %p2732_p2 = scmp.eq.s32.totalorder %s2256_s27, 0 }
  0x6e   : > { %p156_p5 = scmp.eq.s32.totalorder %s2256_s27, 1  ;;  %p162_p7 = scmp.eq.s32.totalorder %s1567_s15, 1 }
  0x6f   : > { %p2395_p6 = por %p2732_p2, %p48_p13  ;;  %p1826_p9 = scmp.lt.s32.totalorder %s2179_s24, 2 }
  0x70   : > { %s256_s17 = sand.u32 1, %s2175_s23   ;;  %p2402_p4 = por %p156_p5, %p42_p3 }
  0x71   : > { %p2406_p10 = por %p162_p7, %p48_p13  ;;  %s1574_s29 = sshll.u32 %s256_s17, 3 }
  0x72   : > { %s2734_s18 = scalar_select %p2402_p4, 1, 0 }
  0x73   : > { %s2735_s25 = scalar_select %p2406_p10, 1, 0 }
  0x74   : > { %s1575_s8 = sshll.u32 %s2179_s24, 7  ;;  %s260_s12 = scalar_lea.vmem [#allocation2], %s1574_s29 }
  0x75   : > { %s2414_s9 = scalar_lea.hbm %s2718_s0, %s1575_s8  ;;  %s267_s13 = sshll.u32 %s260_s12, 4  ;;  %s2416_s13 = int_to_ptr.vmem [resolvable:$true] %s267_s13 }
  0x76   : > { %p2420_p11 = pnand %p1826_p9, %p2389_p0  ;;  %s257_s15 = scalar_lea.sflag [#allocation3], %s256_s17 }
  0x77   : > { %s2043_s19 = scalar_lea.hbm %s2414_s9, 128  ;;  %s2048_s8 = scalar_lea.hbm %s2718_s0, 256 }
  0x78   : > { %p2044_p12 = scmp.ne.s32.totalorder %s2414_s9, %s2043_s19  ;;  %p2045_p1 = pneg %p2420_p11 }
  0x79   : > { %p2049_p13 = scmp.lt.u32.totalorder %s2414_s9, %s2718_s0  ;;  %p2050_p0 = scmp.lt.u32.totalorder %s2048_s8, %s2043_s19 }
  0x7a   : > { %p2046_p3 = pnand %p2045_p1, %p2044_p12  ;;  %p2052_p5 = scmp.lt.u32.totalorder %s2043_s19, %s2414_s9 }
  0x7b   : > { %p2051_p2 = por %p2050_p0, %p2049_p13 }
  0x7c   : > { %p2047_p8 = pneg %p2046_p3 }
  0x7d   : > { %p2053_p7 = por %p2052_p5, %p2051_p2 }
  0x7f   : > { %p2054_p9 = pnand %p2053_p7, %p2047_p8 }
  0x81   : > { %2057 = shalt.err (!%p2054_p9)
}
  0x82   : > { %s2058_s17 = scalar_lea.vmem %s2416_s13, 128  ;;  %s2187_s11 = smov [#allocation2]  }
  0x83   : > { %p2059_p12 = scmp.ne.s32.totalorder %s2416_s13, %s2058_s17  ;;  %s2063_s12 = sshll.u32 %s2187_s11, 4  ;;  %s2064_s12 = int_to_ptr.vmem [resolvable:$false] %s2063_s12 }
  0x84   : > { %s2065_s20 = scalar_lea.vmem %s2064_s12, 256  ;;  %p2066_p4 = scmp.lt.s32.totalorder %s2416_s13, %s2064_s12 }
  0x85   : > { %p2061_p3 = pnand %p2059_p12, %p2045_p1  ;;  %p2067_p13 = scmp.lt.s32.totalorder %s2065_s20, %s2058_s17 }
  0x87   : > { %p2062_p10 = pneg %p2061_p3  ;;  %p2068_p0 = por %p2067_p13, %p2066_p4 }
  0x89   : > { %p2069_p2 = pnand %p2068_p0, %p2062_p10 }
  0x8b   : > { %2072 = shalt.err (!%p2069_p2)
}
  0x8c   : > { %1814 = dma.hbm_to_vmem [thread:$0]  (!%p2420_p11), %s2414_s9, 128, %s2416_s13, %s257_s15  }
  0x8d   : > { %p2737_p8 = scmp.ne.s32.totalorder %s2728_s28, 0 }
  0x8e   : > { %s2452_s19 = sand.u32 (!%p2737_p8), 1, %s2171_s22  }
  0x8f   : > { %276 = sbr.rel (%p2737_p8) target bundleno = 2292 (0x8f4), region = 40  ;;  %s2455_s29 = sshll.u32 (!%p2737_p8), %s2452_s19, 3 }
  0x90   : > { %s279_s8 = scalar_lea.sflag (!%p2737_p8), [#allocation3], %s2452_s19  ;;  %s282_s16 = scalar_lea.vmem (!%p2737_p8), [#allocation2], %s2455_s29 }
  0x96   : > { %2146 = dma.done.wait (%p2395_p6), %s279_s8, 128  }
  0x97   : > { %2148 = vsyncadd (%p2395_p6), %s279_s8, 4294967168  ;;  %p2738_p4 = scmp.eq.s32.totalorder %s2256_s27, 0 }
  0x99   : > { %2150 = dma.done.wait (%p2738_p4), [#allocation6], 272   ;;  %p2739_p10 = pmov %p2738_p4 }
  0x9a   : > { %p2740_p11 = pmov %p2738_p4 }
  0x9b   : > { %2152 = vsyncadd (%p2739_p10), [#allocation6], 4294967024 }
  0x9c   : > { %2154 = dma.done.wait (%p2740_p11), [#allocation9], 272   ;;  %p2741_p1 = pmov %p2738_p4 }
  0x9d   : > { %v2188_v0 = vmov 0.0   ;;  %vm2189_vm0 = vmmov 0   ;;  %v1895_v1 = vld [vmem:[#allocation5] sm:$0xff]   ;;  %v1896_v2 = vld [vmem:[#allocation5 + $0x8] sm:$0xff]   ;;  %v333_v3 = vld [vmem:[%s282_s16] sm:$0xff]  ;;  %vm358_vm1 = vcmask 261120  }
  0x9e   : > { %2156 = vsyncadd (%p2741_p1), [#allocation9], 4294967024  ;;  %1656 = vmatprep.subr.bf16.mxu0 %v2188_v0  ;;  %1660 = vmatprep.mubr.msk.bf16.mxu0 %vm2189_vm0, %v2188_v0  ;;  %v334_v4 = vpack.c.bf16 %v333_v3, %v333_v3  ;;  %v1584_v5 = vld [vmem:[#allocation7] ss:$0 sm:$0xff]  ;;  %s2190_s28 = smov 104   ;;  %s2191_s26 = smov 120  }
  0x9f   : > { %1664 = vmatprep.subr.bf16.mxu1 %v2188_v0  ;;  %1666 = vmatprep.mubr.msk.bf16.mxu1 %vm2189_vm0, %v2188_v0  ;;  %s2192_s9 = smov 112   ;;  %s2193_s13 = smov 96   ;;  %vm419_vm2 = vcmask 64512   ;;  %vm670_vm3 = vcmask 1043456   ;;  %vm1268_vm4 = vcmask 130048   ;;  %vm1270_vm5 = vcmask 195584  }
  0xa0   : > { %1657 = vmatpush3.bf16.msra.mxu0 %v1895_v1  ;;  %s2194_s30 = smov 64   ;;  %s2195_s15 = smov 8  }
  0xa1   : > { %1658 = vmatprep.subr.bf16.mxu0 %v2188_v0  ;;  %s2196_s10 = smov 16   ;;  %s2197_s17 = smov 24  }
  0xa2   : > { %s1611_s11 = sshll.u32 %s2256_s27, 7  ;;  %s324_s12 = scalar_lea.vmem [#allocation11], %s2455_s29 }
  0xa3   : > { %s1414_s20 = sshll.u32 %s324_s12, 4  ;;  %s331_s8 = scalar_lea.vmem [#allocation12], %s2455_s29  ;;  %s2645_s20 = int_to_ptr.vmem [resolvable:$true] %s1414_s20 }
  0xa4   : > { %1659 = vmatpush3.bf16.msra.mxu0 %v1896_v2  ;;  %s1427_s16 = sshll.u32 %s331_s8, 4  ;;  %p2742_p5 = scmp.ne.s32.totalorder %s2734_s18, 0  ;;  %s2652_s16 = int_to_ptr.vmem [resolvable:$true] %s1427_s16 }
  0xa5   : > { %1670 = vmatprep.subr.bf16.mxu0 %v2188_v0 }
  0xa7   : > { %1661 = vmatmul.mubr.msk.bf16.vlgmr.msra.gmra.mrb[0].mxu0 %vm358_vm1, %v334_v4 }
  0xa8   : > { %1672 = vmatprep.mubr.msk.bf16.mxu0 %vm2189_vm0, %v2188_v0 }
 0x17a   : > { %v396_v6 = vpop.f32.mrb[0].mxu0 }
 0x17b   : > { %v397_v7 = vadd.f32 %v1584_v5, %v396_v6  ;;  %v1662_v8 = vpop.f32.mrb[1].mxu0 }
 0x17c   : > { %v399_v9 = vpop.f32.mrb[2].mxu0 }
 0x17d   : > { %409 = vrot.lane.b32.xlu1 %v397_v7, %s2190_s28  ;;  %403 = vrot.lane.b32.xlu0 %v397_v7, %s2191_s26  ;;  %v1663_v10 = vpop.f32.mrb[3].mxu0  ;;  %v2482_v11 = vpack.c.bf16 %v397_v7, %v397_v7 }
 0x181   : > { %406 = vrot.lane.b32.xlu0 %v397_v7, %s2192_s9  ;;  %417 = vrot.lane.b32.xlu1 %v2482_v11, %s2193_s13  ;;  %s2643_s9 = scalar_lea.hbm %s2723_s5, %s1611_s11 }
 0x1ef   : > { %v410_v12 = vpop.permute.xlu1 %409  ;;  %v404_v13 = vpop.permute.xlu0 %403 }
 0x1f0   : > { %v413_v14 = vpack.c.bf16 %v404_v13, %v404_v13  ;;  %v2485_v17 = vpack.c.bf16 %v410_v12, %v410_v12 }
 0x1f2   : > { %467 = vrot.lane.b32.xlu0 %v413_v14, %s2193_s13 }
 0x1f3   : > { %v407_v15 = vpop.permute.xlu0 %406  ;;  %v418_v16 = vpop.permute.xlu1 %417 }
 0x1f4   : > { %v2487_v18 = vpack.c.bf16 %v407_v15, %v407_v15  ;;  %v424_v19 = vsel %vm419_vm2, %v418_v16, 0 }
 0x1f5   : > { %1665 = vmatpush3.bf16.xpose.msra.mxu1 %v424_v19 }
 0x1f6   : > { %565 = vrot.lane.b32.xlu0 %v2485_v17, %s2193_s13  ;;  %516 = vrot.lane.b32.xlu1 %v2487_v18, %s2193_s13  ;;  %s2650_s13 = scalar_lea.hbm %s2724_s6, %s1611_s11 }
 0x1f7   : > { %1676 = vmatprep.subr.bf16.mxu1 %v2188_v0 }
 0x1fc   : > { %1667 = vmatmul.mubr.msk.bf16.vlgmr.msra.gmra.mrb[0].mxu1 %vm419_vm2, %v2482_v11 }
 0x1fd   : > { %1678 = vmatprep.mubr.msk.bf16.mxu1 %vm2189_vm0, %v2188_v0 }
 0x264   : > { %v468_v20 = vpop.permute.xlu0 %467 }
 0x265   : > { %v473_v21 = vsel %vm419_vm2, %v468_v20, 0 }
 0x266   : > { %1671 = vmatpush3.bf16.xpose.msra.mxu0 %v473_v21 }
 0x267   : > { %1682 = vmatprep.subr.bf16.mxu0 %v2188_v0 }
 0x268   : > { %v517_v22 = vpop.permute.xlu1 %516  ;;  %v566_v24 = vpop.permute.xlu0 %565 }
 0x269   : > { %v522_v23 = vsel %vm419_vm2, %v517_v22, 0  ;;  %v571_v25 = vsel %vm419_vm2, %v566_v24, 0 }
 0x26a   : > { %1677 = vmatpush3.bf16.xpose.msra.mxu1 %v522_v23 }
 0x26b   : > { %1688 = vmatprep.subr.bf16.mxu1 %v2188_v0 }
 0x26d   : > { %1673 = vmatmul.mubr.msk.bf16.vlgmr.msra.gmra.mrb[4].mxu0 %vm419_vm2, %v413_v14 }
 0x26e   : > { %1683 = vmatpush3.bf16.xpose.msra.mxu0 %v571_v25  ;;  %1684 = vmatprep.mubr.msk.bf16.mxu0 %vm2189_vm0, %v2188_v0 }
 0x26f   : > { %1694 = vmatprep.subr.bf16.mxu0 %v2188_v0 }
 0x271   : > { %1679 = vmatmul.mubr.msk.bf16.vlgmr.msra.gmra.mrb[4].mxu1 %vm419_vm2, %v2487_v18 }
 0x272   : > { %1690 = vmatprep.mubr.msk.bf16.mxu1 %vm2189_vm0, %v2188_v0 }
 0x275   : > { %1685 = vmatmul.mubr.msk.bf16.vlgmr.msra.gmra.mrb[8].mxu0 %vm419_vm2, %v2485_v17 }
 0x276   : > { %1696 = vmatprep.mubr.msk.bf16.mxu0 %vm2189_vm0, %v2188_v0 }
 0x2cf   : > { %v460_v26 = vpop.f32.mrb[0].mxu1 }
 0x2d0   : > { %v613_v27 = vmul.f32 0.35355338, %v460_v26  ;;  %v1668_v28 = vpop.f32.mrb[1].mxu1 }
 0x2d1   : > { %v463_v29 = vpop.f32.mrb[2].mxu1 }
 0x2d2   : > { %v1669_v30 = vpop.f32.mrb[3].mxu1  ;;  %v617_v31 = vsel %vm419_vm2, %v613_v27, -inf }
 0x2d3   : > { %618 = vmax.xlane.f32.xlu1 %v617_v31 }
 0x340   : > { %v509_v32 = vpop.f32.mrb[4].mxu0 }
 0x341   : > { %v614_v33 = vmul.f32 0.35355338, %v509_v32  ;;  %v1674_v34 = vpop.f32.mrb[5].mxu0 }
 0x342   : > { %v512_v35 = vpop.f32.mrb[6].mxu0 }
 0x343   : > { %v1675_v36 = vpop.f32.mrb[7].mxu0  ;;  %v620_v37 = vsel %vm419_vm2, %v614_v33, -inf }
 0x344   : > { %v558_v38 = vpop.f32.mrb[4].mxu1  ;;  %621 = vmax.xlane.f32.xlu0 %v620_v37 }
 0x345   : > { %v615_v39 = vmul.f32 0.35355338, %v558_v38  ;;  %v1680_v40 = vpop.f32.mrb[5].mxu1 }
 0x346   : > { %v561_v41 = vpop.f32.mrb[6].mxu1 }
 0x347   : > { %v1681_v42 = vpop.f32.mrb[7].mxu1  ;;  %v623_v43 = vsel %vm419_vm2, %v615_v39, -inf }
 0x348   : > { %624 = vmax.xlane.f32.xlu0 %v623_v43  ;;  %v607_v44 = vpop.f32.mrb[8].mxu0 }
 0x349   : > { %v616_v45 = vmul.f32 0.35355338, %v607_v44  ;;  %v1686_v46 = vpop.f32.mrb[9].mxu0 }
 0x34a   : > { %v610_v47 = vpop.f32.mrb[10].mxu0 }
 0x34b   : > { %v1687_v48 = vpop.f32.mrb[11].mxu0  ;;  %v626_v49 = vsel %vm419_vm2, %v616_v45, -inf }
 0x34c   : > { %627 = vmax.xlane.f32.xlu1 %v626_v49 }
 0x35d   : > { %714 = vrot.lane.b32.xlu1 %v413_v14, %s2194_s30 }
 0x35e   : > { %665 = vrot.lane.b32.xlu0 %v2482_v11, %s2194_s30 }
 0x360   : > { %v619_v50 = vpop.xlane.xlu1 %618 }
 0x361   : > { %v629_v51 = vsub.f32 %v613_v27, %v619_v50 }
 0x363   : > { %v633_v52 = vmul.f32 1.442695, %v629_v51 }
 0x365   : > { %1899 = vpow2.f32 %v633_v52 }
 0x36f   : > { %v1900_v53 = vpop.eup %1899 }
 0x370   : > { %v641_v54 = vsel %vm419_vm2, %v1900_v53, 0.0 }
 0x37d   : > { %642 = vadd.xlane.f32.xlu0 %v641_v54 }
 0x3d1   : > { %v622_v55 = vpop.xlane.xlu0 %621 }
 0x3d2   : > { %v630_v56 = vsub.f32 %v614_v33, %v622_v55 }
 0x3d4   : > { %v635_v57 = vmul.f32 1.442695, %v630_v56 }
 0x3d5   : > { %v625_v58 = vpop.xlane.xlu0 %624 }
 0x3d6   : > { %1901 = vpow2.f32 %v635_v57  ;;  %v631_v59 = vsub.f32 %v615_v39, %v625_v58 }
 0x3d8   : > { %v637_v60 = vmul.f32 1.442695, %v631_v59 }
 0x3d9   : > { %v2522_v61 = vpop.permute.xlu0 %665  ;;  %v628_v62 = vpop.xlane.xlu1 %627 }
 0x3da   : > { %1903 = vpow2.f32 %v637_v60  ;;  %v632_v63 = vsub.f32 %v616_v45, %v628_v62  ;;  %v2526_v1 = vsel %vm670_vm3, %v2522_v61, 0  ;;  %v858_v30 = vsel %vm419_vm2, %v2522_v61, 0 }
 0x3db   : > { %1689 = vmatpush3.bf16.msra.mxu1 %v2526_v1 }
 0x3dc   : > { %v639_v2 = vmul.f32 1.442695, %v632_v63  ;;  %1700 = vmatprep.subr.bf16.mxu1 %v2188_v0 }
 0x3dd   : > { %v2530_v3 = vpop.permute.xlu1 %714 }
 0x3de   : > { %1905 = vpow2.f32 %v639_v2  ;;  %v2534_v4 = vsel %vm670_vm3, %v2530_v3, 0  ;;  %v900_v32 = vsel %vm419_vm2, %v2530_v3, 0 }
 0x3df   : > { %1695 = vmatpush3.bf16.msra.mxu0 %v2534_v4 }
 0x3e0   : > { %v1902_v5 = vpop.eup %1901  ;;  %1706 = vmatprep.subr.bf16.mxu0 %v2188_v0 }
 0x3e1   : > { %v644_v6 = vsel %vm419_vm2, %v1902_v5, 0.0 }
 0x3e2   : > { %645 = vadd.xlane.f32.xlu1 %v644_v6 }
 0x3e4   : > { %v1904_v7 = vpop.eup %1903 }
 0x3e5   : > { %v647_v8 = vsel %vm419_vm2, %v1904_v7, 0.0 }
 0x3e6   : > { %648 = vadd.xlane.f32.xlu0 %v647_v8 }
 0x3e8   : > { %v1906_v9 = vpop.eup %1905 }
 0x3e9   : > { %v650_v10 = vsel %vm419_vm2, %v1906_v9, 0.0 }
 0x3ea   : > { %651 = vadd.xlane.f32.xlu1 %v650_v10 }
 0x3fb   : > { %762 = vrot.lane.b32.xlu1 %v2487_v18, %s2194_s30 }
 0x3fc   : > { %810 = vrot.lane.b32.xlu0 %v2485_v17, %s2194_s30  ;;  %s1396_s30 = scalar_lea.sflag [#allocation4], %s2452_s19 }
 0x40a   : > { %v643_v11 = vpop.xlane.xlu0 %642 }
 0x40b   : > { %1907 = vrcp.f32 %v643_v11 }
 0x415   : > { %v1908_v12 = vpop.eup %1907 }
 0x416   : > { %v657_v13 = vmul.f32 %v1908_v12, %v1900_v53 }
 0x418   : > { %v661_v14 = vpack.c.bf16 %v657_v13, %v657_v13 }
 0x41a   : > { %1691 = vmatmul.mubr.msk.bf16.vlgmr.msra.gmra.mrb[8].mxu1 %vm419_vm2, %v661_v14 }
 0x41b   : > { %1702 = vmatprep.mubr.msk.bf16.mxu1 %vm2189_vm0, %v2188_v0 }
 0x46f   : > { %v646_v15 = vpop.xlane.xlu1 %645 }
 0x470   : > { %1909 = vrcp.f32 %v646_v15 }
 0x473   : > { %v649_v16 = vpop.xlane.xlu0 %648 }
 0x474   : > { %1911 = vrcp.f32 %v649_v16 }
 0x477   : > { %v652_v19 = vpop.xlane.xlu1 %651  ;;  %v811_v17 = vpop.permute.xlu0 %810 }
 0x478   : > { %1913 = vrcp.f32 %v652_v19  ;;  %v2555_v26 = vsel %vm670_vm3, %v811_v17, 0  ;;  %v984_v34 = vsel %vm419_vm2, %v811_v17, 0 }
 0x47a   : > { %v1910_v18 = vpop.eup %1909 }
 0x47b   : > { %v658_v20 = vmul.f32 %v1910_v18, %v1902_v5  ;;  %v763_v21 = vpop.permute.xlu1 %762 }
 0x47c   : > { %v2549_v22 = vsel %vm670_vm3, %v763_v21, 0  ;;  %v942_v33 = vsel %vm419_vm2, %v763_v21, 0 }
 0x47d   : > { %1701 = vmatpush3.bf16.msra.mxu1 %v2549_v22  ;;  %v662_v23 = vpack.c.bf16 %v658_v20, %v658_v20 }
 0x47e   : > { %v1912_v24 = vpop.eup %1911  ;;  %1712 = vmatprep.subr.bf16.mxu1 %v2188_v0 }
 0x47f   : > { %v659_v25 = vmul.f32 %v1912_v24, %v1904_v7  ;;  %1697 = vmatmul.mubr.msk.bf16.vlgmr.msra.gmra.mrb[12].mxu0 %vm419_vm2, %v662_v23 }
 0x480   : > { %1707 = vmatpush3.bf16.msra.mxu0 %v2555_v26  ;;  %1708 = vmatprep.mubr.msk.bf16.mxu0 %vm2189_vm0, %v2188_v0 }
 0x481   : > { %v663_v27 = vpack.c.bf16 %v659_v25, %v659_v25  ;;  %1718 = vmatprep.subr.bf16.mxu0 %v2188_v0 }
 0x482   : > { %v1914_v28 = vpop.eup %1913 }
 0x483   : > { %v660_v29 = vmul.f32 %v1914_v28, %v1906_v9  ;;  %1703 = vmatmul.mubr.msk.bf16.vlgmr.msra.gmra.mrb[12].mxu1 %vm419_vm2, %v663_v27 }
 0x484   : > { %1714 = vmatprep.mubr.msk.bf16.mxu1 %vm2189_vm0, %v2188_v0 }
 0x485   : > { %v664_v31 = vpack.c.bf16 %v660_v29, %v660_v29 }
 0x486   : > { %1713 = vmatpush3.bf16.xpose.msra.mxu1 %v858_v30 }
 0x487   : > { %1709 = vmatmul.mubr.msk.bf16.vlgmr.msra.gmra.mrb[16].mxu0 %vm419_vm2, %v664_v31  ;;  %1724 = vmatprep.subr.bf16.mxu1 %v2188_v0 }
 0x488   : > { %1720 = vmatprep.mubr.msk.bf16.mxu0 %vm2189_vm0, %v2188_v0 }
 0x489   : > { %1719 = vmatpush3.bf16.xpose.msra.mxu0 %v900_v32 }
 0x48a   : > { %1730 = vmatprep.subr.bf16.mxu0 %v2188_v0 }
 0x48d   : > { %1715 = vmatmul.mubr.msk.bf16.vlgmr.msra.gmra.mrb[16].mxu1 %vm419_vm2, %v2522_v61 }
 0x48e   : > { %1725 = vmatpush3.bf16.xpose.msra.mxu1 %v942_v33  ;;  %1726 = vmatprep.mubr.msk.bf16.mxu1 %vm2189_vm0, %v2188_v0 }
 0x48f   : > { %1736 = vmatprep.subr.bf16.mxu1 %v2188_v0 }
 0x490   : > { %1721 = vmatmul.mubr.msk.bf16.vlgmr.msra.gmra.mrb[20].mxu0 %vm419_vm2, %v2530_v3 }
 0x491   : > { %1731 = vmatpush3.bf16.xpose.msra.mxu0 %v984_v34  ;;  %1732 = vmatprep.mubr.msk.bf16.mxu0 %vm2189_vm0, %v2188_v0 }
 0x492   : > { %1742 = vmatprep.subr.bf16.mxu0 %v2188_v0 }
 0x495   : > { %1727 = vmatmul.mubr.msk.bf16.vlgmr.msra.gmra.mrb[20].mxu1 %vm419_vm2, %v763_v21 }
 0x496   : > { %1737 = vmatpush3.bf16.msra.mxu1 %v2526_v1  ;;  %1738 = vmatprep.mubr.msk.bf16.mxu1 %vm2189_vm0, %v2188_v0 }
 0x497   : > { %1748 = vmatprep.subr.bf16.mxu1 %v2188_v0 }
 0x498   : > { %1733 = vmatmul.mubr.msk.bf16.vlgmr.msra.gmra.mrb[24].mxu0 %vm419_vm2, %v811_v17 }
 0x499   : > { %1743 = vmatpush3.bf16.msra.mxu0 %v2534_v4  ;;  %1744 = vmatprep.mubr.msk.bf16.mxu0 %vm2189_vm0, %v2188_v0 }
 0x49a   : > { %1754 = vmatprep.subr.bf16.mxu0 %v2188_v0 }
 0x4ed   : > { %v2595_v35 = vpop.f32.mrb[8].mxu1 }
 0x4ee   : > { %v1692_v36 = vpop.f32.mrb[9].mxu1 }
 0x4ef   : > { %v711_v37 = vpop.f32.mrb[10].mxu1 }
 0x4f0   : > { %v1693_v38 = vpop.f32.mrb[11].mxu1 }
 0x552   : > { %v2597_v39 = vpop.f32.mrb[12].mxu0 }
 0x553   : > { %v1698_v40 = vpop.f32.mrb[13].mxu0 }
 0x554   : > { %v759_v41 = vpop.f32.mrb[14].mxu0 }
 0x555   : > { %v1699_v42 = vpop.f32.mrb[15].mxu0 }
 0x556   : > { %v2599_v43 = vpop.f32.mrb[12].mxu1 }
 0x557   : > { %v1704_v44 = vpop.f32.mrb[13].mxu1 }
 0x558   : > { %v807_v45 = vpop.f32.mrb[14].mxu1 }
 0x559   : > { %v1705_v46 = vpop.f32.mrb[15].mxu1 }
 0x55a   : > { %v2601_v47 = vpop.f32.mrb[16].mxu0 }
 0x55b   : > { %v1710_v48 = vpop.f32.mrb[17].mxu0 }
 0x55c   : > { %v855_v49 = vpop.f32.mrb[18].mxu0 }
 0x55d   : > { %v1711_v50 = vpop.f32.mrb[19].mxu0 }
 0x560   : > { %v894_v51 = vpop.f32.mrb[16].mxu1 }
 0x561   : > { %v1026_v52 = vmul.f32 0.35355338, %v894_v51  ;;  %v1716_v53 = vpop.f32.mrb[17].mxu1 }
 0x562   : > { %v897_v54 = vpop.f32.mrb[18].mxu1  ;;  %v1897_v53 = vld [vmem:[#allocation8] sm:$0xff]  }
 0x563   : > { %v936_v55 = vpop.f32.mrb[20].mxu0  ;;  %v1717_v56 = vpop.f32.mrb[19].mxu1  ;;  %v1030_v57 = vsel %vm419_vm2, %v1026_v52, -inf }
 0x564   : > { %v1027_v58 = vmul.f32 0.35355338, %v936_v55  ;;  %v1722_v59 = vpop.f32.mrb[21].mxu0  ;;  %1031 = vmax.xlane.f32.xlu1 %v1030_v57 }
 0x565   : > { %v939_v60 = vpop.f32.mrb[22].mxu0 }
 0x566   : > { %v1723_v61 = vpop.f32.mrb[23].mxu0  ;;  %v1033_v62 = vsel %vm419_vm2, %v1027_v58, -inf  ;;  %v1898_v60 = vld [vmem:[#allocation8 + $0x8] sm:$0xff]  }
 0x567   : > { %1034 = vmax.xlane.f32.xlu0 %v1033_v62 }
 0x568   : > { %v978_v63 = vpop.f32.mrb[20].mxu1 }
 0x569   : > { %v1028_v1 = vmul.f32 0.35355338, %v978_v63  ;;  %v1728_v2 = vpop.f32.mrb[21].mxu1 }
 0x56a   : > { %v981_v3 = vpop.f32.mrb[22].mxu1 }
 0x56b   : > { %v1020_v4 = vpop.f32.mrb[24].mxu0  ;;  %v1729_v5 = vpop.f32.mrb[23].mxu1  ;;  %v1036_v6 = vsel %vm419_vm2, %v1028_v1, -inf }
 0x56c   : > { %v1029_v7 = vmul.f32 0.35355338, %v1020_v4  ;;  %v1734_v8 = vpop.f32.mrb[25].mxu0  ;;  %1037 = vmax.xlane.f32.xlu0 %v1036_v6 }
 0x56d   : > { %v1023_v9 = vpop.f32.mrb[26].mxu0 }
 0x56e   : > { %v1735_v10 = vpop.f32.mrb[27].mxu0  ;;  %v1039_v11 = vsel %vm419_vm2, %v1029_v7, -inf }
 0x56f   : > { %1040 = vmax.xlane.f32.xlu1 %v1039_v11 }
 0x5f1   : > { %v1032_v12 = vpop.xlane.xlu1 %1031 }
 0x5f2   : > { %v1042_v13 = vsub.f32 %v1026_v52, %v1032_v12 }
 0x5f4   : > { %v1046_v14 = vmul.f32 1.442695, %v1042_v13  ;;  %v1035_v15 = vpop.xlane.xlu0 %1034 }
 0x5f5   : > { %v1043_v16 = vsub.f32 %v1027_v58, %v1035_v15 }
 0x5f6   : > { %1915 = vpow2.f32 %v1046_v14 }
 0x5f7   : > { %v1048_v19 = vmul.f32 1.442695, %v1043_v16 }
 0x5f9   : > { %1917 = vpow2.f32 %v1048_v19  ;;  %v1038_v18 = vpop.xlane.xlu0 %1037 }
 0x5fa   : > { %v1044_v20 = vsub.f32 %v1028_v1, %v1038_v18 }
 0x5fc   : > { %v1050_v21 = vmul.f32 1.442695, %v1044_v20  ;;  %v1041_v17 = vpop.xlane.xlu1 %1040 }
 0x5fd   : > { %v1045_v23 = vsub.f32 %v1029_v7, %v1041_v17 }
 0x5fe   : > { %1919 = vpow2.f32 %v1050_v21 }
 0x5ff   : > { %v1052_v24 = vmul.f32 1.442695, %v1045_v23 }
 0x600   : > { %v1916_v25 = vpop.eup %1915 }
 0x601   : > { %1921 = vpow2.f32 %v1052_v24  ;;  %v1054_v27 = vsel %vm419_vm2, %v1916_v25, 0.0  ;;  %v1604_v24 = vld [vmem:[#allocation10] ss:$0 sm:$0xff] }
 0x602   : > { %1055 = vadd.xlane.f32.xlu0 %v1054_v27 }
 0x603   : > { %v1918_v28 = vpop.eup %1917 }
 0x604   : > { %v1057_v29 = vsel %vm419_vm2, %v1918_v28, 0.0 }
 0x605   : > { %1058 = vadd.xlane.f32.xlu1 %v1057_v29 }
 0x608   : > { %v1920_v30 = vpop.eup %1919 }
 0x609   : > { %v1060_v31 = vsel %vm419_vm2, %v1920_v30, 0.0 }
 0x60a   : > { %1061 = vadd.xlane.f32.xlu0 %v1060_v31 }
 0x60b   : > { %v1922_v32 = vpop.eup %1921 }
 0x60c   : > { %v1063_v33 = vsel %vm419_vm2, %v1922_v32, 0.0 }
 0x60d   : > { %1064 = vadd.xlane.f32.xlu1 %v1063_v33 }
 0x68f   : > { %v1056_v34 = vpop.xlane.xlu0 %1055 }
 0x690   : > { %1923 = vrcp.f32 %v1056_v34 }
 0x692   : > { %v1059_v36 = vpop.xlane.xlu1 %1058 }
 0x693   : > { %1925 = vrcp.f32 %v1059_v36 }
 0x697   : > { %v1062_v37 = vpop.xlane.xlu0 %1061 }
 0x698   : > { %1927 = vrcp.f32 %v1062_v37 }
 0x69a   : > { %v1924_v38 = vpop.eup %1923  ;;  %v1065_v40 = vpop.xlane.xlu1 %1064 }
 0x69b   : > { %v1070_v41 = vmul.f32 %v1924_v38, %v1916_v25  ;;  %1929 = vrcp.f32 %v1065_v40 }
 0x69d   : > { %v1926_v42 = vpop.eup %1925  ;;  %v1074_v44 = vpack.c.bf16 %v1070_v41, %v1070_v41 }
 0x69e   : > { %v1071_v45 = vmul.f32 %v1926_v42, %v1918_v28 }
 0x69f   : > { %1739 = vmatmul.mubr.msk.bf16.vlgmr.msra.gmra.mrb[24].mxu1 %vm419_vm2, %v1074_v44 }
 0x6a0   : > { %1749 = vmatpush3.bf16.msra.mxu1 %v2549_v22  ;;  %v1075_v46 = vpack.c.bf16 %v1071_v45, %v1071_v45  ;;  %1750 = vmatprep.mubr.msk.bf16.mxu1 %vm2189_vm0, %v2188_v0 }
 0x6a1   : > { %1760 = vmatprep.subr.bf16.mxu1 %v2188_v0 }
 0x6a2   : > { %v1928_v48 = vpop.eup %1927  ;;  %1745 = vmatmul.mubr.msk.bf16.vlgmr.msra.gmra.mrb[28].mxu0 %vm419_vm2, %v1075_v46 }
 0x6a3   : > { %v1072_v49 = vmul.f32 %v1928_v48, %v1920_v30  ;;  %1755 = vmatpush3.bf16.msra.mxu0 %v2555_v26  ;;  %1756 = vmatprep.mubr.msk.bf16.mxu0 %vm2189_vm0, %v2188_v0 }
 0x6a4   : > { %1768 = vmatprep.subr.bf16.mxu0 %v2188_v0 }
 0x6a5   : > { %v1930_v50 = vpop.eup %1929  ;;  %v1076_v51 = vpack.c.bf16 %v1072_v49, %v1072_v49 }
 0x6a6   : > { %v1073_v22 = vmul.f32 %v1930_v50, %v1922_v32 }
 0x6a7   : > { %1751 = vmatmul.mubr.msk.bf16.vlgmr.msra.gmra.mrb[28].mxu1 %vm419_vm2, %v1076_v51 }
 0x6a8   : > { %v1077_v52 = vpack.c.bf16 %v1073_v22, %v1073_v22  ;;  %1764 = vmatprep.mubr.msk.bf16.mxu1 %vm2189_vm0, %v2188_v0  ;;  %1761 = vmatpush3.bf16.msra.mxu1 %v1897_v53 }
 0x6a9   : > { %1762 = vmatprep.subr.bf16.mxu1 %v2188_v0 }
 0x6aa   : > { %1757 = vmatmul.mubr.msk.bf16.vlgmr.msra.gmra.mrb[32].mxu0 %vm419_vm2, %v1077_v52 }
 0x6ab   : > { %1772 = vmatprep.mubr.msk.bf16.mxu0 %vm2189_vm0, %v2188_v0  ;;  %1769 = vmatpush3.bf16.msra.mxu0 %v1897_v53 }
 0x6ac   : > { %1770 = vmatprep.subr.bf16.mxu0 %v2188_v0  ;;  %1763 = vmatpush3.bf16.msra.mxu1 %v1898_v60 }
 0x6af   : > { %1771 = vmatpush3.bf16.msra.mxu0 %v1898_v60 }
 0x772   : > { %v1115_v26 = vpop.f32.mrb[24].mxu1 }
 0x773   : > { %v1740_v54 = vpop.f32.mrb[25].mxu1 }
 0x774   : > { %v1118_v55 = vpop.f32.mrb[26].mxu1 }
 0x775   : > { %v1158_v56 = vpop.f32.mrb[28].mxu0  ;;  %v1741_v57 = vpop.f32.mrb[27].mxu1 }
 0x776   : > { %v1880_v58 = vpack.i.bf16 %v2597_v39, %v1158_v56  ;;  %v1746_v59 = vpop.f32.mrb[29].mxu0 }
 0x777   : > { %v1161_v61 = vpop.f32.mrb[30].mxu0 }
 0x778   : > { %1881 = vrot.lane.b32.xlu0 %v1880_v58, %s2195_s15  ;;  %v1747_v62 = vpop.f32.mrb[31].mxu0  ;;  %s2073_s15 = scalar_lea.vmem %s2645_s20, 128 }
 0x779   : > { %p2074_p6 = scmp.ne.s32.totalorder %s2645_s20, %s2073_s15 }
 0x77a   : > { %v1201_v63 = vpop.f32.mrb[28].mxu1 }
 0x77b   : > { %v1885_v1 = vpack.i.bf16 %v2599_v43, %v1201_v63  ;;  %v1752_v2 = vpop.f32.mrb[29].mxu1  ;;  %p2075_p7 = pnand %p2074_p6, %p2742_p5 }
 0x77c   : > { %v1204_v3 = vpop.f32.mrb[30].mxu1 }
 0x77d   : > { %v1244_v4 = vpop.f32.mrb[32].mxu0  ;;  %v1753_v5 = vpop.f32.mrb[31].mxu1  ;;  %1886 = vrot.lane.b32.xlu1 %v1885_v1, %s2196_s10  ;;  %p2076_p9 = pneg %p2075_p7  ;;  %s2198_s10 = smov [#allocation11]  }
 0x77e   : > { %v1890_v0 = vpack.i.bf16 %v2601_v47, %v1244_v4  ;;  %v1758_v39 = vpop.f32.mrb[33].mxu0 }
 0x77f   : > { %v1247_v6 = vpop.f32.mrb[34].mxu0 }
 0x780   : > { %v1759_v7 = vpop.f32.mrb[35].mxu0 }
 0x781   : > { %1891 = vrot.lane.b32.xlu1 %v1890_v0, %s2197_s17  ;;  %s2077_s17 = sshll.u32 %s2198_s10, 4  ;;  %s2078_s17 = int_to_ptr.vmem [resolvable:$false] %s2077_s17 }
 0x782   : > { %s2079_s28 = scalar_lea.vmem %s2078_s17, 256  ;;  %p2080_p12 = scmp.lt.s32.totalorder %s2645_s20, %s2078_s17 }
 0x783   : > { %p2081_p3 = scmp.lt.s32.totalorder %s2079_s28, %s2073_s15 }
 0x785   : > { %p2082_p13 = por %p2081_p3, %p2080_p12 }
 0x787   : > { %p2083_p0 = pnand %p2082_p13, %p2076_p9 }
 0x7ea   : > { %v1882_v8 = vpop.permute.xlu0 %1881 }
 0x7eb   : > { %v1884_v10 = vunpack.i.h.bf16 %v1882_v8  ;;  %v1883_v11 = vunpack.i.l.bf16 %v1882_v8 }
 0x7ed   : > { %v1346_v14 = vsel %vm419_vm2, %v2595_v35, %v1884_v10  ;;  %v1267_v47 = vsel %vm419_vm2, %v1115_v26, %v1883_v11 }
 0x7ef   : > { %v1887_v9 = vpop.permute.xlu1 %1886 }
 0x7f0   : > { %v1889_v12 = vunpack.i.h.bf16 %v1887_v9  ;;  %v1888_v13 = vunpack.i.l.bf16 %v1887_v9 }
 0x7f2   : > { %v1269_v19 = vsel %vm1268_vm4, %v1267_v47, %v1888_v13  ;;  %v1347_v18 = vsel %vm1268_vm4, %v1346_v14, %v1889_v12 }
 0x7f3   : > { %v1892_v43 = vpop.permute.xlu1 %1891 }
 0x7f4   : > { %v1894_v15 = vunpack.i.h.bf16 %v1892_v43  ;;  %v1893_v16 = vunpack.i.l.bf16 %v1892_v43 }
 0x7f6   : > { %v1348_v20 = vsel %vm1270_vm5, %v1347_v18, %v1894_v15  ;;  %v1271_v21 = vsel %vm1270_vm5, %v1269_v19, %v1893_v16 }
 0x7f7   : > { %v1349_v17 = vpack.c.bf16 %v1348_v20, %v1348_v20  ;;  %v1272_v23 = vpack.c.bf16 %v1271_v21, %v1271_v21 }
 0x7f9   : > { %1765 = vmatmul.mubr.msk.bf16.vlgmr.msra.gmra.mrb[32].mxu1 %vm358_vm1, %v1272_v23  ;;  %1773 = vmatmul.mubr.msk.bf16.vlgmr.msra.gmra.mrb[36].mxu0 %vm358_vm1, %v1349_v17 }
 0x8cc   : > { %v1328_v35 = vpop.f32.mrb[32].mxu1  ;;  %v1387_v25 = vpop.f32.mrb[36].mxu0 }
 0x8cd   : > { %v1329_v27 = vadd.f32 %v1604_v24, %v1328_v35  ;;  %v1388_v28 = vadd.f32 %v1604_v24, %v1387_v25  ;;  %v1766_v29 = vpop.f32.mrb[33].mxu1  ;;  %v1774_v30 = vpop.f32.mrb[37].mxu0 }
 0x8ce   : > { %v1331_v31 = vpop.f32.mrb[34].mxu1  ;;  %v1390_v32 = vpop.f32.mrb[38].mxu0 }
 0x8cf   : > { %v1767_v33 = vpop.f32.mrb[35].mxu1  ;;  %v1775_v34 = vpop.f32.mrb[39].mxu0  ;;  %1393 = vst.msk [vmem:[%s324_s12] sm:$0xff] %vm358_vm1, %v1329_v27  ;;  %1394 = vst.msk [vmem:[%s331_s8] sm:$0xff] %vm358_vm1, %v1388_v28 }
 0x8d0   : > { %2086 = shalt.err (!%p2083_p0)
}
 0x8d1   : > { %s2087_s11 = scalar_lea.hbm %s2643_s9, 128  ;;  %s2091_s26 = scalar_lea.hbm %s2723_s5, 256 }
 0x8d2   : > { %p2088_p2 = scmp.ne.s32.totalorder %s2643_s9, %s2087_s11  ;;  %p2092_p10 = scmp.lt.u32.totalorder %s2643_s9, %s2723_s5 }
 0x8d3   : > { %p2093_p11 = scmp.lt.u32.totalorder %s2091_s26, %s2087_s11  ;;  %p2095_p6 = scmp.lt.u32.totalorder %s2087_s11, %s2643_s9 }
 0x8d4   : > { %p2089_p8 = pnand %p2088_p2, %p2742_p5 }
 0x8d5   : > { %p2094_p1 = por %p2093_p11, %p2092_p10 }
 0x8d6   : > { %p2090_p4 = pneg %p2089_p8 }
 0x8d7   : > { %p2096_p7 = por %p2095_p6, %p2094_p1 }
 0x8d9   : > { %p2097_p9 = pnand %p2096_p7, %p2090_p4 }
 0x8db   : > { %2100 = shalt.err (!%p2097_p9)
}
 0x8dc   : > { %1794 = dma.vmem_to_hbm [thread:$0]  (%p2742_p5), %s2645_s20, 128, %s2643_s9, %s1396_s30  }
 0x8dd   : > { %s1401_s15 = scalar_lea.sflag [#allocation13], %s2452_s19  ;;  %s2101_s10 = scalar_lea.vmem %s2652_s16, 128 }
 0x8de   : > { %p2102_p12 = scmp.ne.s32.totalorder %s2652_s16, %s2101_s10  ;;  %s2199_s17 = smov [#allocation12]  }
 0x8df   : > { %s2105_s28 = sshll.u32 %s2199_s17, 4  ;;  %s2106_s28 = int_to_ptr.vmem [resolvable:$false] %s2105_s28 }
 0x8e0   : > { %p2103_p3 = pnand %p2102_p12, %p2742_p5  ;;  %s2107_s11 = scalar_lea.vmem %s2106_s28, 256 }
 0x8e1   : > { %p2108_p0 = scmp.lt.s32.totalorder %s2652_s16, %s2106_s28  ;;  %p2109_p2 = scmp.lt.s32.totalorder %s2107_s11, %s2101_s10 }
 0x8e2   : > { %p2104_p13 = pneg %p2103_p3 }
 0x8e3   : > { %p2110_p8 = por %p2109_p2, %p2108_p0 }
 0x8e5   : > { %p2111_p4 = pnand %p2110_p8, %p2104_p13 }
 0x8e7   : > { %2114 = shalt.err (!%p2111_p4)
}
 0x8e8   : > { %s2115_s19 = scalar_lea.hbm %s2650_s13, 128  ;;  %s2119_s30 = scalar_lea.hbm %s2724_s6, 256 }
 0x8e9   : > { %p2116_p10 = scmp.ne.s32.totalorder %s2650_s13, %s2115_s19  ;;  %p2120_p6 = scmp.lt.u32.totalorder %s2650_s13, %s2724_s6 }
 0x8ea   : > { %p2121_p7 = scmp.lt.u32.totalorder %s2119_s30, %s2115_s19  ;;  %p2123_p12 = scmp.lt.u32.totalorder %s2115_s19, %s2650_s13 }
 0x8eb   : > { %p2117_p11 = pnand %p2116_p10, %p2742_p5 }
 0x8ec   : > { %p2122_p9 = por %p2121_p7, %p2120_p6 }
 0x8ed   : > { %p2118_p1 = pneg %p2117_p11 }
 0x8ee   : > { %p2124_p3 = por %p2123_p12, %p2122_p9 }
 0x8f0   : > { %p2125_p13 = pnand %p2124_p3, %p2118_p1 }
 0x8f2   : > { %2128 = shalt.err (!%p2125_p13)
}
 0x8f3   : > { %1795 = dma.vmem_to_hbm [thread:$0]  (%p2742_p5), %s2652_s16, 128, %s2650_s13, %s1401_s15  }
 0x8f4 PF: > { %s1439_s26 = sand.u32 1, %s2167_s21   ;;  %p2743_p0 = scmp.ne.s32.totalorder %s2735_s25, 0 }
 0x8f5   : > { %p2744_p2 = scmp.ge.s32.totalorder %s2179_s24, 2  ;;  %s1440_s27 = scalar_lea.sflag [#allocation4], %s1439_s26 }
 0x8f7   : > { %p1816_p8 = pnand %p2744_p2, %p2743_p0 }
 0x8f9   : > { %2158 = dma.done.wait (!%p1816_p8), %s1440_s27, 128  }
 0x8fa   : > { %2160 = vsyncadd (!%p1816_p8), %s1440_s27, 4294967168  ;;  %s1449_s29 = scalar_lea.sflag [#allocation13], %s1439_s26 }
 0x8fb   : > { %2162 = dma.done.wait (!%p1816_p8), %s1449_s29, 128  }
 0x8fc   : > { %2164 = vsyncadd (!%p1816_p8), %s1449_s29, 4294967168  ;;  %p25_p5 = scmp.ge.s32.totalorder %s2376_s7, 4   ;;  %s2745_s21 = smov %s2171_s22 }
 0x8fd   : > { %s2746_s22 = smov %s2175_s23  ;;  %s2747_s23 = smov %s2387_s14 }
 0x8fe   : > { %s2748_s24 = smov %s2376_s7  ;;  %27 = sbr.rel (!%p25_p5) target bundleno = 9 (0x9), region = 118 }
 0x905   :  { %1454 = vsyncpa [#allocation3], 1 }
 0x906   :  { %1456 = vsyncpa [#allocation3 + $0x1], 1 }
 0x907   :  { %1457 = vsyncpa [#allocation6], 1 }
 0x908   :  { %1458 = vsyncpa [#allocation9], 1 }
 0x909   :  { %1459 = vsyncpa [#allocation4], 1 }
 0x90a   :  { %1461 = vsyncpa [#allocation4 + $0x1], 1 }
 0x90b   :  { %1462 = vsyncpa [#allocation13], 1 }
 0x90c   :  { %1464 = vsyncpa [#allocation13 + $0x1], 1 }

</bundles_post_ra>
